<compile_context>
chip_gen: v6e
topology: v6e:2x2x1
jax: 0.10.0
libtpu: 0.0.40
codegen_flags: <defaults>
</compile_context>

<pallas_src>
import math

import jax
import jax.numpy as jnp
from jax.experimental import pallas as pl
from jax.experimental.pallas import tpu as pltpu


# ----------------------------------------------------------------------------
# Pallas kernel: (tb, tc) x-tile + (1, tc) pe-tile, broadcast over sublanes.
# ----------------------------------------------------------------------------
def _add_pe_kernel(x_ref, pe_ref, o_ref):
    o_ref[...] = x_ref[...] + pe_ref[...]


def make_positional_encoding(length: int, d_model: int = 20,
                             dtype=jnp.float32) -> jax.Array:
    """Deterministic construction of the pe buffer, identical to __init__."""
    position = jnp.arange(length, dtype=jnp.float32)[:, None]            # (L, 1)
    div_term = jnp.exp(
        jnp.arange(0, d_model, 2, dtype=jnp.float32)
        * (-math.log(10000.0) / d_model))                                # (ceil(D/2),)
    ang = position * div_term                                            # (L, ceil(D/2))
    pe = jnp.zeros((length, d_model), jnp.float32)
    pe = pe.at[:, 0::2].set(jnp.sin(ang)[:, : (d_model + 1) // 2])
    pe = pe.at[:, 1::2].set(jnp.cos(ang)[:, : d_model // 2])
    return pe[None, :, :].astype(dtype)                                  # (1, L, D)


def positional_encoding_forward(x: jax.Array, pe: jax.Array, *,
                                max_block_bytes: int = 2 * 1024 * 1024
                                ) -> jax.Array:
    """x: (B, L, D), pe: (1, max_len>=L, D) -> (B, L, D) = x + pe[:, :L]."""
    B, L, D = x.shape
    assert pe.ndim == 3 and pe.shape[0] == 1 and pe.shape[2] == D
    assert pe.shape[1] >= L, "pe table shorter than sequence"
    pe = pe[:, :L, :].astype(x.dtype)  # PyTorch buffer semantics (len == L)

    # ---- layout plumbing (outside the kernel, all free contiguous reshapes).
    C = L * D
    x2 = x.reshape(B, C)                 # (B, L*D): lane-dense for L*D >= 128
    pe2 = pe.reshape(1, C)               # (1, L*D): broadcast over batch in-kernel
    itemsize = x.dtype.itemsize

    # ---- pick block shape (tb, tc): ~max_block_bytes of x per grid step.
    if C * itemsize <= max_block_bytes:
        tc = C                                           # full extent -> any size OK
        rows_fit = max(1, max_block_bytes // (C * itemsize))
        if B <= rows_fit:
            tb = B                                       # full extent -> any size OK
        else:
            tb = max(8, (rows_fit // 8) * 8)             # (8, .) sublane tiling
    else:
        # One row is already bigger than the budget: tile lanes in 128-multiples.
        tc = max(128, (max_block_bytes // (8 * itemsize) // 128) * 128)
        tb = B if B <= 8 else 8

    # Batch axis last (fastest): pe's block index repeats between consecutive
    # grid steps, so its DMA is skipped; ragged edge blocks are masked by Pallas.
    grid = (pl.cdiv(C, tc), pl.cdiv(B, tb))

    out2 = pl.pallas_call(
        _add_pe_kernel,
        out_shape=jax.ShapeDtypeStruct((B, C), x.dtype),
        grid=grid,
        in_specs=[
            pl.BlockSpec((tb, tc), lambda jc, ib: (ib, jc)),   # x
            pl.BlockSpec((1, tc), lambda jc, ib: (0, jc)),     # pe (batch-broadcast)
        ],
        out_specs=pl.BlockSpec((tb, tc), lambda jc, ib: (ib, jc)),
        compiler_params=pltpu.CompilerParams(
            dimension_semantics=("parallel", "parallel")),
    )(x2, pe2)

    return out2.reshape(B, L, D)


if __name__ == "__main__":
    # Default module shape: batch=2, seq len=8, d_model=20.
    B, L, D = 2, 8, 20
    key = jax.random.PRNGKey(0)
    x = jax.random.normal(key, (B, L, D), dtype=jnp.float32)
    pe = make_positional_encoding(L, D, dtype=jnp.float32)

    out = jax.block_until_ready(positional_encoding_forward(x, pe))
    ref = x + pe
    assert out.shape == (B, L, D)
    assert jnp.allclose(out, ref, atol=1e-6), "mismatch vs reference (default)"

    # Exercise multi-block grids with ragged edges on both axes by shrinking
    # the per-block byte budget; also exercises a pe table built at max_len.
    B2, L2, D2 = 20, 48, 20                      # C = 960 (not a 128 multiple)
    x2 = jax.random.normal(jax.random.PRNGKey(1), (B2, L2, D2), jnp.float32)
    pe2 = make_positional_encoding(2 * L2, D2, dtype=jnp.float32)  # longer table
    out_a = jax.block_until_ready(
        positional_encoding_forward(x2, pe2, max_block_bytes=4096))   # batch-tiled
    out_b = jax.block_until_ready(
        positional_encoding_forward(x2, pe2, max_block_bytes=2048))   # batch+lane tiled
    ref2 = x2 + pe2[:, :L2, :]
    assert jnp.allclose(out_a, ref2, atol=1e-6), "mismatch vs reference (batch-tiled)"
    assert jnp.allclose(out_b, ref2, atol=1e-6), "mismatch vs reference (2-D tiled)"

    print("KERNEL_OK")
</pallas_src>

<mosaic_0001>
module attributes {stable_mosaic.version = 11 : i64} {
  func.func @_add_pe_kernel(%arg0: i32, %arg1: i32, %arg2: memref<2x160xf32, #tpu.memory_space<vmem>>, %arg3: memref<1x160xf32, #tpu.memory_space<vmem>>, %arg4: memref<2x160xf32, #tpu.memory_space<vmem>>) attributes {dimension_semantics = [#tpu.dimension_semantics<parallel>, #tpu.dimension_semantics<parallel>], iteration_bounds = array<i64: 1, 1>, scalar_prefetch = 0 : i64, scratch_operands = 0 : i64, tpu.core_type = #tpu.core_type<tc>, window_params = [{transform_indices = @transform_0, window_bounds = array<i64: 2, 160>}, {transform_indices = @transform_1, window_bounds = array<i64: 1, 160>}, {transform_indices = @transform_2, window_bounds = array<i64: 2, 160>}]} {
    %c0 = arith.constant 0 : index
    %c0_0 = arith.constant 0 : index
    %0 = vector.load %arg2[%c0, %c0_0] : memref<2x160xf32, #tpu.memory_space<vmem>>, vector<2x160xf32>
    %c0_1 = arith.constant 0 : index
    %c0_2 = arith.constant 0 : index
    %1 = vector.load %arg3[%c0_1, %c0_2] : memref<1x160xf32, #tpu.memory_space<vmem>>, vector<1x160xf32>
    %2 = vector.broadcast %1 : vector<1x160xf32> to vector<2x160xf32>
    %3 = arith.addf %0, %2 : vector<2x160xf32>
    %c0_3 = arith.constant 0 : index
    %c0_4 = arith.constant 0 : index
    %4 = vector.load %arg4[%c0_3, %c0_4] : memref<2x160xf32, #tpu.memory_space<vmem>>, vector<2x160xf32>
    tpu.vector_store %arg4[%c0_3, %c0_4], %3 {strides = array<i32>} : memref<2x160xf32, #tpu.memory_space<vmem>>, vector<2x160xf32>,
    return
  }
  func.func @transform_0(%arg0: i32, %arg1: i32) -> (i32, i32) {
    %c0_i32 = arith.constant 0 : i32
    return %arg1, %arg0 : i32, i32
  }
  func.func @transform_1(%arg0: i32, %arg1: i32) -> (i32, i32) {
    %c0_i32 = arith.constant 0 : i32
    %c0_i32_0 = arith.constant 0 : i32
    return %c0_i32, %arg0 : i32, i32
  }
  func.func @transform_2(%arg0: i32, %arg1: i32) -> (i32, i32) {
    %c0_i32 = arith.constant 0 : i32
    return %arg1, %arg0 : i32, i32
  }
}

</mosaic_0001>

<bundles_post_ra>
// kernel: tpu_custom_call.1
= control target key start
LH: loop header
LB: loop body
LE: loop exit
PB: predicated region body
PF: predicated region fallthrough
CT: control target
= control target key end

     0   :  { %7 = vsyncpa [#allocation3], 0  ;;  %s175_s0 = inlined_call_operand.hbm [shape: f32[2,160], index: 0, kind: input, shape index: {}]   ;;  %s176_s1 = inlined_call_operand.hbm [shape: f32[1,160], index: 1, kind: input, shape index: {}]   ;;  %s177_s2 = inlined_call_operand.hbm [shape: f32[2,160], index: 2, kind: output, shape index: {}]  }
   0x1   :  { %8 = vsyncpa [#allocation6], 0 }
   0x2   :  { %9 = vsyncpa [#allocation4], 0  ;;  %s147_s9 = smov [#allocation2]   ;;  %s148_s11 = smov [#allocation5]  }
   0x3   :  { %s16_s10 = sshll.u32 %s147_s9, 4  ;;  %s26_s12 = sshll.u32 %s148_s11, 4  ;;  %s17_s10 = int_to_ptr.vmem [resolvable:$true] %s16_s10  ;;  %s27_s12 = int_to_ptr.vmem [resolvable:$true] %s26_s12 }
   0x4   :  { %s89_s13 = scalar_lea.vmem %s17_s10, 64  ;;  %p94_p1 = scmp.lt.s32.totalorder %s17_s10, %s17_s10 }
   0x5   :  { %p90_p0 = scmp.ne.s32.totalorder %s17_s10, %s89_s13  ;;  %p95_p2 = scmp.lt.s32.totalorder %s89_s13, %s89_s13 }
   0x7   :  { %p96_p3 = por %p95_p2, %p94_p1 }
   0x9   :  { %p97_p4 = pnand %p96_p3, %p90_p0 }
   0xb   :  { %100 = shalt.err (!%p97_p4)
}
   0xc   :  { %19 = dma.hbm_to_vmem [thread:$0]  %s175_s0, 64, %s17_s10, [#allocation3]  }
   0xd   :  { %s109_s16 = scalar_lea.vmem %s27_s12, 32  ;;  %p114_p6 = scmp.lt.s32.totalorder %s27_s12, %s27_s12 }
   0xe   :  { %p110_p5 = scmp.ne.s32.totalorder %s27_s12, %s109_s16  ;;  %p115_p7 = scmp.lt.s32.totalorder %s109_s16, %s109_s16 }
  0x10   :  { %p116_p8 = por %p115_p7, %p114_p6 }
  0x12   :  { %p117_p9 = pnand %p116_p8, %p110_p5 }
  0x14   :  { %120 = shalt.err (!%p117_p9)
}
  0x15   :  { %29 = dma.hbm_to_vmem [thread:$0]  %s176_s1, 32, %s27_s12, [#allocation6]  }
  0x16   :  { %141 = dma.done.wait [#allocation3], 64  }
  0x17   :  { %142 = vsyncadd [#allocation3], 4294967232 }
  0x18   :  { %143 = dma.done.wait [#allocation6], 32  }
  0x19   :  { %144 = vsyncadd [#allocation6], 4294967264  ;;  %v39_v0 = vlaneseq  ;;  %v149_v1 = vmov 1983009808   ;;  %v37_v7 = vld [vmem:[#allocation5] sm:$0x3] }
  0x1a   :  { %v49_v2 = vunpack.c.l.s4 %v149_v1  ;;  %vm57_vm0 = vcmask 1041408   ;;  %vm58_vm1 = vcmask 257026   ;;  %v36_v12 = vld [vmem:[#allocation2] sm:$0xf]  ;;  %s150_s0 = smov [#allocation7]  }
  0x1b   :  { %v40_v3 = vshrl.u32 %v39_v0, 7  ;;  %s67_s1 = sshll.u32 %s150_s0, 4  ;;  %vm59_vm2 = vmor %vm58_vm1, %vm57_vm0  ;;  %s68_s1 = int_to_ptr.vmem [resolvable:$true] %s67_s1 }
  0x1c   :  { %v50_v6 = vunpack.c.0.s8 %v49_v2  ;;  %s121_s19 = scalar_lea.vmem %s68_s1, 64  ;;  %p126_p11 = scmp.lt.s32.totalorder %s68_s1, %s68_s1 }
  0x1d   :  { %v41_v4 = vsub.s32 0, %v40_v3  ;;  %v45_v5 = vsub.s32 1, %v40_v3  ;;  %p122_p10 = scmp.ne.s32.totalorder %s68_s1, %s121_s19  ;;  %p127_p12 = scmp.lt.s32.totalorder %s121_s19, %s121_s19 }
  0x1e   :  { %v53_v10 = vsub.s32 %v50_v6, %v40_v3 }
  0x1f   :  { %v42_v8 = vrot.slane %v37_v7, %v41_v4  ;;  %v46_v9 = vrot.slane %v37_v7, %v45_v5  ;;  %p128_p13 = por %p127_p12, %p126_p11 }
  0x21   :  { %v47_v11 = vcombine.low %v42_v8, %v46_v9  ;;  %p129_p0 = pnand %p128_p13, %p122_p10 }
  0x23   :  { %v54_v13 = vrot.slane %v47_v11, %v53_v10 }
  0x25   :  { %v56_v14 = vadd.f32 %v54_v13, %v36_v12 }
  0x27   :  { %60 = vst.msk [vmem:[#allocation7] sm:$0xf] %vm59_vm2, %v56_v14 }
  0x28   :  { %132 = shalt.err (!%p129_p0)
}
  0x29   :  { %70 = dma.vmem_to_hbm [thread:$0]  %s68_s1, 64, %s177_s2, [#allocation4]  }
  0x2a   :  { %145 = dma.done.wait [#allocation4], 64  }
  0x2b   :  { %146 = vsyncadd [#allocation4], 4294967232 }
  0x2c   :  { %74 = vsyncpa [#allocation3], 1 }
  0x2d   :  { %75 = vsyncpa [#allocation6], 1 }
  0x2e   :  { %76 = vsyncpa [#allocation4], 1 }

</bundles_post_ra>
